<compile_context>
chip_gen: v7x
topology: tpu7x:2x2x1
jax: 0.10.0
libtpu: 0.0.40
codegen_flags: <defaults>
</compile_context>

<pallas_src>
import jax
import jax.numpy as jnp
from jax.experimental import pallas as pl
from jax.experimental.pallas import tpu as pltpu


def _riemann_noise_kernel(scal_ref, x_ref, A_ref, b_ref, noise_ref, o_ref):
    # scal_ref : SMEM (3,)          -> [alpha, r, w]
    # x_ref    : VMEM (bn, C, HW)
    # A_ref    : VMEM (1, HW)
    # b_ref    : VMEM (1, HW)
    # noise_ref: VMEM (bn, C, HW)
    # o_ref    : VMEM (bn, C, HW)
    alpha = scal_ref[0]
    r = scal_ref[1]
    w_p = scal_ref[2]

    x = x_ref[...]                                           # (bn, C, HW)

    # s, _ = torch.max(-x, dim=1, keepdim=True)  -> channel-wise max (XLU sublane reduce)
    s = jnp.max(-x, axis=1, keepdims=True)                   # (bn, 1, HW)
    # s = s - s.mean(dim=(2,3), keepdim=True)    -> spatial mean (lane reduce)
    s = s - jnp.mean(s, axis=-1, keepdims=True)
    # s = s / (|s|.amax + 1e-8)                  -> divide moved to EUP reciprocal
    s_max = jnp.max(jnp.abs(s), axis=-1, keepdims=True)
    s = s * pl.reciprocal(s_max + 1e-8, approx=True)
    # s = (s + 1) / 2 ; s = s * A + b
    s = (s + 1.0) * 0.5
    s = s * A_ref[...] + b_ref[...]                          # (bn, 1, HW)

    # sp_att_mask: computed once on the channel-invariant map (identical to the
    # per-channel RMS in the reference since s is tiled across channels).
    m = alpha + (1.0 - alpha) * s
    m = m * jax.lax.rsqrt(jnp.mean(m * m, axis=-1, keepdims=True) + 1e-8)
    m = r * m                                                # (bn, 1, HW)

    # x = (x + noise * w) * sp_att_mask  -> broadcast over channels only here.
    y = (x + noise_ref[...] * w_p) * m
    o_ref[...] = y.astype(o_ref.dtype)


def riemann_noise_forward(x, A, b, alpha, r, w_param, noise, *, samples_per_step=None):
    """x, noise: (N, C, H, W) f32; A, b: (H, W); alpha, r, w_param: (1,)."""
    N, C, H, W = x.shape
    HW = H * W

    # Lane-dense layout: last BlockSpec dim = H*W (multiple of 128 for H=W=16).
    x2 = x.reshape(N, C, HW)
    noise2 = noise.reshape(N, C, HW)
    A2 = A.reshape(1, HW)
    b2 = b.reshape(1, HW)

    scalars = jnp.concatenate(
        [alpha.reshape(1), r.reshape(1), w_param.reshape(1)]
    ).astype(jnp.float32)                                    # (3,) in SMEM

    if samples_per_step is None:
        # Whole batch in one grid step for small problems. For very large
        # C*H*W (v7x: only 64 MiB VMEM/TC, ~32 MiB scoped default), pick the
        # largest divisor of N whose 3 double-buffered (bn,C,HW) f32 blocks
        # stay under ~half the scoped VMEM limit.
        budget = 16 * 1024 * 1024
        per_sample = 3 * 2 * C * HW * 4                      # x + noise + out, 2 bufs
        bn = max(1, min(N, budget // max(per_sample, 1)))
        while N % bn != 0:
            bn -= 1
        samples_per_step = bn
    bn = samples_per_step
    assert N % bn == 0, "samples_per_step must divide N"

    grid_spec = pltpu.PrefetchScalarGridSpec(
        num_scalar_prefetch=0,
        grid=(N // bn,),
        in_specs=[
            pl.BlockSpec(memory_space=pltpu.MemorySpace.SMEM),       # scalars
            pl.BlockSpec((bn, C, HW), lambda n: (n, 0, 0)),          # x
            pl.BlockSpec((1, HW), lambda n: (0, 0)),                 # A
            pl.BlockSpec((1, HW), lambda n: (0, 0)),                 # b
            pl.BlockSpec((bn, C, HW), lambda n: (n, 0, 0)),          # noise
        ],
        out_specs=pl.BlockSpec((bn, C, HW), lambda n: (n, 0, 0)),
    )

    out = pl.pallas_call(
        _riemann_noise_kernel,
        out_shape=jax.ShapeDtypeStruct((N, C, HW), x.dtype),
        grid_spec=grid_spec,
        compiler_params=pltpu.CompilerParams(
            dimension_semantics=("parallel",)),   # shards batch blocks across TCs on v7x
    )(scalars, x2, A2, b2, noise2)

    return out.reshape(N, C, H, W)


def riemann_noise_reference(x, A, b, alpha, r, w_param, noise):
    """Pure-JAX reference of the PyTorch forward (noise passed explicitly)."""
    N, C, H, W = x.shape
    s = jnp.max(-x, axis=1, keepdims=True)
    s = s - jnp.mean(s, axis=(2, 3), keepdims=True)
    s_max = jnp.max(jnp.abs(s), axis=(2, 3), keepdims=True)
    s = s / (s_max + 1e-8)
    s = (s + 1.0) / 2.0
    s = s * A + b
    s = jnp.tile(s, (1, C, 1, 1))
    m = alpha + (1.0 - alpha) * s
    m = m * jax.lax.rsqrt(jnp.mean(m * m, axis=(2, 3), keepdims=True) + 1e-8)
    m = r * m
    return (x + noise * w_param) * m


if __name__ == "__main__":
    # Module config: RiemannNoise(size=16, channels=4)
    N, C, H, W = 2, 4, 16, 16

    key = jax.random.PRNGKey(0)
    k_x, k_A, k_b, k_noise = jax.random.split(key, 4)

    # Deterministic parameter init (matches __init__ shapes):
    A = jax.random.normal(k_A, (H, W), dtype=jnp.float32)      # normal_(ones(h,w))
    ch = jnp.zeros((C,), dtype=jnp.float32)                    # constant(ones(c), 0) -- unused in forward
    b = jax.random.normal(k_b, (H, W), dtype=jnp.float32)      # normal_(ones(h,w))
    alpha = jnp.full((1,), 0.5, dtype=jnp.float32)
    r = jnp.full((1,), 0.5, dtype=jnp.float32)
    w_param = jnp.full((1,), 0.5, dtype=jnp.float32)

    x = jax.random.normal(k_x, (N, C, H, W), dtype=jnp.float32)
    # self.noise.repeat(*x.size()).normal_(): fresh standard-normal of x's shape,
    # generated deterministically here and fed into the kernel.
    noise = jax.random.normal(k_noise, (N, C, H, W), dtype=jnp.float32)

    out = riemann_noise_forward(x, A, b, alpha, r, w_param, noise)
    out = jax.block_until_ready(out)

    ref = riemann_noise_reference(x, A, b, alpha, r, w_param, noise)
    assert out.shape == (N, C, H, W)
    # Slightly relaxed tolerance to accommodate the EUP approximate reciprocal.
    assert jnp.allclose(out, ref, rtol=2e-3, atol=2e-3), "mismatch vs reference"

    print("KERNEL_OK")
</pallas_src>

<mosaic_0001>
module attributes {stable_mosaic.version = 11 : i64} {
  func.func @_riemann_noise_kernel(%arg0: i32, %arg1: memref<3xf32, #tpu.memory_space<smem>>, %arg2: memref<2x4x256xf32, #tpu.memory_space<vmem>>, %arg3: memref<1x256xf32, #tpu.memory_space<vmem>>, %arg4: memref<1x256xf32, #tpu.memory_space<vmem>>, %arg5: memref<2x4x256xf32, #tpu.memory_space<vmem>>, %arg6: memref<2x4x256xf32, #tpu.memory_space<vmem>>) attributes {dimension_semantics = [#tpu.dimension_semantics<parallel>], iteration_bounds = array<i64: 1>, scalar_prefetch = 0 : i64, scratch_operands = 0 : i64, tpu.core_type = #tpu.core_type<tc>, window_params = [{transform_indices = @transform_0, window_bounds = array<i64: 3>}, {transform_indices = @transform_1, window_bounds = array<i64: 2, 4, 256>}, {pipeline_mode = #tpu.pipeline_mode<synchronous>, transform_indices = @transform_2, window_bounds = array<i64: 1, 256>}, {pipeline_mode = #tpu.pipeline_mode<synchronous>, transform_indices = @transform_3, window_bounds = array<i64: 1, 256>}, {transform_indices = @transform_4, window_bounds = array<i64: 2, 4, 256>}, {transform_indices = @transform_5, window_bounds = array<i64: 2, 4, 256>}]} {
    %c0 = arith.constant 0 : index
    %0 = memref.load %arg1[%c0] : memref<3xf32, #tpu.memory_space<smem>>
    %c1 = arith.constant 1 : index
    %1 = memref.load %arg1[%c1] : memref<3xf32, #tpu.memory_space<smem>>
    %c2 = arith.constant 2 : index
    %2 = memref.load %arg1[%c2] : memref<3xf32, #tpu.memory_space<smem>>
    %c0_0 = arith.constant 0 : index
    %c0_1 = arith.constant 0 : index
    %c0_2 = arith.constant 0 : index
    %3 = vector.load %arg2[%c0_0, %c0_1, %c0_2] : memref<2x4x256xf32, #tpu.memory_space<vmem>>, vector<2x4x256xf32>
    %cst = arith.constant 0.000000e+00 : f32
    %4 = vector.broadcast %cst : f32 to vector<2x4x256xf32>
    %5 = arith.subf %4, %3 : vector<2x4x256xf32>
    %cst_3 = arith.constant dense<0xFF800000> : vector<2x256xf32>
    %6 = vector.multi_reduction <maximumf>, %5, %cst_3 [1] : vector<2x4x256xf32> to vector<2x256xf32>
    %7 = vector.shape_cast %6 : vector<2x256xf32> to vector<2x1x256xf32>
    %cst_4 = arith.constant dense<0.000000e+00> : vector<2x1xf32>
    %8 = vector.multi_reduction <add>, %7, %cst_4 [2] : vector<2x1x256xf32> to vector<2x1xf32>
    %9 = vector.shape_cast %8 : vector<2x1xf32> to vector<2x1x1xf32>
    %cst_5 = arith.constant 2.560000e+02 : f32
    %10 = vector.broadcast %cst_5 : f32 to vector<2x1x1xf32>
    %11 = arith.divf %9, %10 : vector<2x1x1xf32>
    %12 = vector.broadcast %11 : vector<2x1x1xf32> to vector<2x1x256xf32>
    %13 = arith.subf %7, %12 : vector<2x1x256xf32>
    %14 = math.absf %13 : vector<2x1x256xf32>
    %cst_6 = arith.constant dense<0xFF800000> : vector<2x1xf32>
    %15 = vector.multi_reduction <maximumf>, %14, %cst_6 [2] : vector<2x1x256xf32> to vector<2x1xf32>
    %16 = vector.shape_cast %15 : vector<2x1xf32> to vector<2x1x1xf32>
    %cst_7 = arith.constant 9.99999993E-9 : f32
    %17 = vector.broadcast %cst_7 : f32 to vector<2x1x1xf32>
    %18 = arith.addf %16, %17 : vector<2x1x1xf32>
    %19 = tpu.reciprocal %18 {approx = true} : vector<2x1x1xf32> -> vector<2x1x1xf32>
    %20 = vector.broadcast %19 : vector<2x1x1xf32> to vector<2x1x256xf32>
    %21 = arith.mulf %13, %20 : vector<2x1x256xf32>
    %cst_8 = arith.constant 1.000000e+00 : f32
    %22 = vector.broadcast %cst_8 : f32 to vector<2x1x256xf32>
    %23 = arith.addf %21, %22 : vector<2x1x256xf32>
    %cst_9 = arith.constant 5.000000e-01 : f32
    %24 = vector.broadcast %cst_9 : f32 to vector<2x1x256xf32>
    %25 = arith.mulf %23, %24 : vector<2x1x256xf32>
    %c0_10 = arith.constant 0 : index
    %c0_11 = arith.constant 0 : index
    %26 = vector.load %arg3[%c0_10, %c0_11] : memref<1x256xf32, #tpu.memory_space<vmem>>, vector<1x256xf32>
    %27 = vector.shape_cast %26 : vector<1x256xf32> to vector<1x1x256xf32>
    %28 = vector.broadcast %27 : vector<1x1x256xf32> to vector<2x1x256xf32>
    %29 = arith.mulf %25, %28 : vector<2x1x256xf32>
    %c0_12 = arith.constant 0 : index
    %c0_13 = arith.constant 0 : index
    %30 = vector.load %arg4[%c0_12, %c0_13] : memref<1x256xf32, #tpu.memory_space<vmem>>, vector<1x256xf32>
    %31 = vector.shape_cast %30 : vector<1x256xf32> to vector<1x1x256xf32>
    %32 = vector.broadcast %31 : vector<1x1x256xf32> to vector<2x1x256xf32>
    %33 = arith.addf %29, %32 : vector<2x1x256xf32>
    %cst_14 = arith.constant 1.000000e+00 : f32
    %34 = arith.subf %cst_14, %0 : f32
    %35 = vector.broadcast %34 : f32 to vector<2x1x256xf32>
    %36 = arith.mulf %35, %33 : vector<2x1x256xf32>
    %37 = vector.broadcast %0 : f32 to vector<2x1x256xf32>
    %38 = arith.addf %37, %36 : vector<2x1x256xf32>
    %39 = arith.mulf %38, %38 : vector<2x1x256xf32>
    %cst_15 = arith.constant dense<0.000000e+00> : vector<2x1xf32>
    %40 = vector.multi_reduction <add>, %39, %cst_15 [2] : vector<2x1x256xf32> to vector<2x1xf32>
    %41 = vector.shape_cast %40 : vector<2x1xf32> to vector<2x1x1xf32>
    %cst_16 = arith.constant 2.560000e+02 : f32
    %42 = vector.broadcast %cst_16 : f32 to vector<2x1x1xf32>
    %43 = arith.divf %41, %42 : vector<2x1x1xf32>
    %cst_17 = arith.constant 9.99999993E-9 : f32
    %44 = vector.broadcast %cst_17 : f32 to vector<2x1x1xf32>
    %45 = arith.addf %43, %44 : vector<2x1x1xf32>
    %46 = math.rsqrt %45 : vector<2x1x1xf32>
    %47 = vector.broadcast %46 : vector<2x1x1xf32> to vector<2x1x256xf32>
    %48 = arith.mulf %38, %47 : vector<2x1x256xf32>
    %49 = vector.broadcast %1 : f32 to vector<2x1x256xf32>
    %50 = arith.mulf %49, %48 : vector<2x1x256xf32>
    %c0_18 = arith.constant 0 : index
    %c0_19 = arith.constant 0 : index
    %c0_20 = arith.constant 0 : index
    %51 = vector.load %arg5[%c0_18, %c0_19, %c0_20] : memref<2x4x256xf32, #tpu.memory_space<vmem>>, vector<2x4x256xf32>
    %52 = vector.broadcast %2 : f32 to vector<2x4x256xf32>
    %53 = arith.mulf %51, %52 : vector<2x4x256xf32>
    %54 = arith.addf %3, %53 : vector<2x4x256xf32>
    %55 = vector.broadcast %50 : vector<2x1x256xf32> to vector<2x4x256xf32>
    %56 = arith.mulf %54, %55 : vector<2x4x256xf32>
    %c0_21 = arith.constant 0 : index
    %c0_22 = arith.constant 0 : index
    %c0_23 = arith.constant 0 : index
    %57 = vector.load %arg6[%c0_21, %c0_22, %c0_23] : memref<2x4x256xf32, #tpu.memory_space<vmem>>, vector<2x4x256xf32>
    tpu.vector_store %arg6[%c0_21, %c0_22, %c0_23], %56 {strides = array<i32>} : memref<2x4x256xf32, #tpu.memory_space<vmem>>, vector<2x4x256xf32>,
    return
  }
  func.func @transform_0(%arg0: i32) -> i32 {
    %c0_i32 = arith.constant 0 : i32
    %c0_i32_0 = arith.constant 0 : i32
    return %c0_i32 : i32
  }
  func.func @transform_1(%arg0: i32) -> (i32, i32, i32) {
    %c0_i32 = arith.constant 0 : i32
    %c0_i32_0 = arith.constant 0 : i32
    %c0_i32_1 = arith.constant 0 : i32
    return %arg0, %c0_i32, %c0_i32_0 : i32, i32, i32
  }
  func.func @transform_2(%arg0: i32) -> (i32, i32) {
    %c0_i32 = arith.constant 0 : i32
    %c0_i32_0 = arith.constant 0 : i32
    %c0_i32_1 = arith.constant 0 : i32
    return %c0_i32, %c0_i32_0 : i32, i32
  }
  func.func @transform_3(%arg0: i32) -> (i32, i32) {
    %c0_i32 = arith.constant 0 : i32
    %c0_i32_0 = arith.constant 0 : i32
    %c0_i32_1 = arith.constant 0 : i32
    return %c0_i32, %c0_i32_0 : i32, i32
  }
  func.func @transform_4(%arg0: i32) -> (i32, i32, i32) {
    %c0_i32 = arith.constant 0 : i32
    %c0_i32_0 = arith.constant 0 : i32
    %c0_i32_1 = arith.constant 0 : i32
    return %arg0, %c0_i32, %c0_i32_0 : i32, i32, i32
  }
  func.func @transform_5(%arg0: i32) -> (i32, i32, i32) {
    %c0_i32 = arith.constant 0 : i32
    %c0_i32_0 = arith.constant 0 : i32
    %c0_i32_1 = arith.constant 0 : i32
    return %arg0, %c0_i32, %c0_i32_0 : i32, i32, i32
  }
}

</mosaic_0001>

<bundles_post_ra>
// kernel: tpu_custom_call.1
= control target key start
LH: loop header
LB: loop body
LE: loop exit
PB: predicated region body
PF: predicated region fallthrough
CT: control target
= control target key end

     0   :  { %10 = vsyncpa [#allocation5], 0  ;;  %s483_s0 = inlined_call_operand.hbm [shape: f32[3], index: 0, kind: input, shape index: {}]   ;;  %s484_s1 = inlined_call_operand.hbm [shape: f32[2,4,256], index: 1, kind: input, shape index: {}]   ;;  %s485_s2 = inlined_call_operand.vmem [shape: f32[1,256], index: 2, kind: input, shape index: {}]   ;;  %s486_s3 = inlined_call_operand.vmem [shape: f32[1,256], index: 3, kind: input, shape index: {}]   ;;  %s487_s4 = inlined_call_operand.hbm [shape: f32[2,4,256], index: 4, kind: input, shape index: {}]   ;;  %s488_s5 = inlined_call_operand.hbm [shape: f32[2,4,256], index: 5, kind: output, shape index: {}]  }
   0x1   :  { %11 = vsyncpa [#allocation3], 0 }
   0x2   :  { %12 = vsyncpa [#allocation8], 0 }
   0x3   :  { %13 = vsyncpa [#allocation4], 0  ;;  %s284_s20 = scalar_lea.hbm %s483_s0, 16 }
   0x4   :  { %p285_p0 = scmp.ne.s32.totalorder %s483_s0, %s284_s20  ;;  %p288_p1 = scmp.lt.u32.totalorder %s284_s20, %s483_s0 }
   0x6   :  { %p290_p2 = pnand %p288_p1, %p285_p0 }
   0x8   :  { %293 = shalt.err (!%p290_p2)
}
   0x9   :  { %s368_s25 = smov [#allocation2]   ;;  %s369_s28 = smov [#allocation6]  }
   0xa   :  { %21 = dma.hbm_to_smem %s483_s0, 16, %s368_s25, [#allocation5]  }
   0xb   :  { %s27_s29 = sshll.u32 %s369_s28, 4  ;;  %s294_s7 = scalar_lea.hbm %s484_s1, 256  ;;  %s28_s29 = int_to_ptr.vmem [resolvable:$true] %s27_s29 }
   0xc   :  { %p295_p3 = scmp.ne.s32.totalorder %s484_s1, %s294_s7  ;;  %p298_p4 = scmp.lt.u32.totalorder %s294_s7, %s484_s1 }
   0xe   :  { %p300_p5 = pnand %p298_p4, %p295_p3 }
  0x10   :  { %303 = shalt.err (!%p300_p5)
}
  0x11   :  { %s304_s12 = scalar_lea.vmem %s28_s29, 256  ;;  %p309_p7 = scmp.lt.s32.totalorder %s28_s29, %s28_s29 }
  0x12   :  { %p305_p6 = scmp.ne.s32.totalorder %s28_s29, %s304_s12  ;;  %p310_p8 = scmp.lt.s32.totalorder %s304_s12, %s304_s12 }
  0x14   :  { %p311_p9 = por %p310_p8, %p309_p7 }
  0x16   :  { %p312_p10 = pnand %p311_p9, %p305_p6 }
  0x18   :  { %315 = shalt.err (!%p312_p10)
}
  0x19   :  { %s370_s0 = smov 128   ;;  %s371_s13 = smov 8  }
  0x1a   :  { %33 = dma.hbm_to_vmem [thread:$0]  %s484_s1, 256, %s28_s29, [#allocation3], %s370_s0, %s370_s0, %s371_s13  }
  0x1b   :  { %s372_s16 = smov [#allocation7]   ;;  %s316_s20 = scalar_lea.hbm %s487_s4, 256 }
  0x1c   :  { %s43_s17 = sshll.u32 %s372_s16, 4  ;;  %p317_p11 = scmp.ne.s32.totalorder %s487_s4, %s316_s20  ;;  %s44_s17 = int_to_ptr.vmem [resolvable:$true] %s43_s17 }
  0x1d   :  { %p320_p12 = scmp.lt.u32.totalorder %s316_s20, %s487_s4 }
  0x1f   :  { %p322_p13 = pnand %p320_p12, %p317_p11 }
  0x21   :  { %325 = shalt.err (!%p322_p13)
}
  0x22   :  { %s326_s25 = scalar_lea.vmem %s44_s17, 256  ;;  %p331_p1 = scmp.lt.s32.totalorder %s44_s17, %s44_s17 }
  0x23   :  { %p327_p0 = scmp.ne.s32.totalorder %s44_s17, %s326_s25  ;;  %p332_p2 = scmp.lt.s32.totalorder %s326_s25, %s326_s25 }
  0x25   :  { %p333_p3 = por %p332_p2, %p331_p1 }
  0x27   :  { %p334_p4 = pnand %p333_p3, %p327_p0 }
  0x29   :  { %337 = shalt.err (!%p334_p4)
}
  0x2a   :  { %49 = dma.hbm_to_vmem [thread:$0]  %s487_s4, 256, %s44_s17, [#allocation8], %s370_s0, %s370_s0, %s371_s13  }
  0x2b   :  { %360 = dma.done.wait [#allocation5], 16  }
  0x2c   :  { %361 = vsyncadd [#allocation5], 4294967280 }
  0x2d   :  { %362 = dma.done.wait [#allocation3], 256  }
  0x2e   :  { %363 = vsyncadd [#allocation3], 4294967040 }
  0x2f   :  { %364 = dma.done.wait [#allocation8], 256  }
  0x30   :  { %365 = vsyncadd [#allocation8], 4294967040 }
  0x31   :  { %59 = sfence }
  0x32   :  { %v446_v0 = vld [vmem:[#allocation6] sm:$0xff]  ;;  %vm73_vm0 = vcmask 1043456   ;;  %v448_v1 = vld [vmem:[#allocation6 + $0x8] sm:$0xff]  ;;  %v143_v53 = vlaneseq  ;;  %s60_s4 = sld [smem:[#allocation2]]  ;;  %v141_v59 = vld [vmem:[%s485_s2] sm:$0x3] }
  0x33   :  { %v65_v2 = vsub.f32 0.0, %v446_v0  ;;  %v66_v3 = vsub.f32 0.0, %v448_v1  ;;  %v157_v62 = vld [vmem:[%s486_s3] sm:$0x3]  ;;  %vm188_vm1 = vcmask 1040384   ;;  %s269_s2 = sld [smem:[#allocation2 + $0x2]] }
  0x34   :  { %v144_v55 = vshrl.u32 %v143_v53, 7  ;;  %s268_s3 = sld [smem:[#allocation2 + $0x1]]  ;;  %s373_s7 = smov [#allocation9]  }
  0x35   :  { %v69_v4 = vcombine.high %v65_v2, %v65_v2  ;;  %v74_v5 = vsel %vm73_vm0, %v65_v2, -inf  ;;  %v70_v6 = vcombine.high %v66_v3, %v66_v3  ;;  %v88_v7 = vsel %vm73_vm0, %v66_v3, -inf  ;;  %s254_s8 = sshll.u32 %s373_s7, 4  ;;  %s255_s8 = int_to_ptr.vmem [resolvable:$true] %s254_s8 }
  0x36   :  { %v75_v8 = vrot.slane %v74_v5, 4  ;;  %v89_v9 = vrot.slane %v88_v7, 4  ;;  %v452_v56 = vsub.s32 0, %v144_v55  ;;  %v149_v57 = vsub.s32 1, %v144_v55  ;;  %s338_s9 = scalar_lea.vmem %s255_s8, 256  ;;  %p343_p6 = scmp.lt.s32.totalorder %s255_s8, %s255_s8 }
  0x37   :  { %v81_v10 = vsel %vm73_vm0, %v69_v4, -inf  ;;  %v95_v11 = vsel %vm73_vm0, %v70_v6, -inf  ;;  %p339_p5 = scmp.ne.s32.totalorder %s255_s8, %s338_s9  ;;  %p344_p7 = scmp.lt.s32.totalorder %s338_s9, %s338_s9 }
  0x38   :  { %v76_v12 = vmax.f32 %v74_v5, %v75_v8  ;;  %v82_v13 = vrot.slane %v81_v10, 4  ;;  %v90_v14 = vmax.f32 %v88_v7, %v89_v9  ;;  %v96_v15 = vrot.slane %v95_v11, 4  ;;  %s173_s6 = ssub.f32 1.0, %s60_s4 }
  0x39   :  { %v146_v3 = vrot.slane %v141_v59, %v452_v56  ;;  %v150_v4 = vrot.slane %v141_v59, %v149_v57  ;;  %v162_v6 = vrot.slane %v157_v62, %v452_v56  ;;  %v166_v7 = vrot.slane %v157_v62, %v149_v57  ;;  %p345_p8 = por %p344_p7, %p343_p6 }
  0x3a   :  { %v77_v16 = vrot.slane %v76_v12, 2  ;;  %v83_v17 = vmax.f32 %v81_v10, %v82_v13  ;;  %v91_v18 = vrot.slane %v90_v14, 2  ;;  %v97_v19 = vmax.f32 %v95_v11, %v96_v15 }
  0x3b   :  { %v209_v53 = vstv %s268_s3  ;;  %p346_p9 = pnand %p345_p8, %p339_p5 }
  0x3c   :  { %v78_v20 = vmax.f32 %v76_v12, %v77_v16  ;;  %v84_v21 = vrot.slane %v83_v17, 2  ;;  %v92_v22 = vmax.f32 %v90_v14, %v91_v18  ;;  %v98_v23 = vrot.slane %v97_v19, 2 }
  0x3d   :  { %v174_v16 = vstv %s173_s6 }
  0x3e   :  { %v79_v24 = vrot.slane %v78_v20, 1  ;;  %v85_v25 = vmax.f32 %v83_v17, %v84_v21  ;;  %v93_v26 = vrot.slane %v92_v22, 1  ;;  %v99_v27 = vmax.f32 %v97_v19, %v98_v23 }
  0x3f   :  { %v179_v21 = vstv %s60_s4 }
  0x40   :  { %v80_v28 = vmax.f32 %v78_v20, %v79_v24  ;;  %v86_v29 = vrot.slane %v85_v25, 1  ;;  %v100_v30 = vrot.slane %v99_v27, 1  ;;  %v94_v32 = vmax.f32 %v92_v22, %v93_v26 }
  0x42   :  { %v87_v31 = vmax.f32 %v85_v25, %v86_v29  ;;  %v101_v33 = vmax.f32 %v99_v27, %v100_v30 }
  0x44   :  { %v102_v34 = vadd.f32 %v87_v31, %v80_v28  ;;  %v105_v35 = vadd.f32 %v101_v33, %v94_v32 }
  0x46   :  { %103 = vadd.xlane.f32.xlu0 %v102_v34 }
  0x4a   :  { %106 = vadd.xlane.f32.xlu0 %v105_v35 }
  0xd3   :  { %v104_v36 = vpop.xlane.xlu0 %103 }
  0xd4   :  { %v109_v37 = vmul.f32 0.00390625, %v104_v36 }
  0xd6   :  { %v111_v38 = vsub.f32 %v80_v28, %v109_v37  ;;  %v112_v39 = vsub.f32 %v87_v31, %v109_v37 }
  0xd7   :  { %v107_v40 = vpop.xlane.xlu0 %106 }
  0xd8   :  { %v110_v41 = vmul.f32 0.00390625, %v107_v40  ;;  %v115_v42 = vand.u32 2147483647, %v111_v38  ;;  %v116_v43 = vand.u32 2147483647, %v112_v39 }
  0xda   :  { %v113_v44 = vsub.f32 %v94_v32, %v110_v41  ;;  %v114_v45 = vsub.f32 %v101_v33, %v110_v41  ;;  %v119_v46 = vmax.f32.f32 %v115_v42, %v116_v43 }
  0xdc   :  { %120 = vmax.xlane.f32.xlu1 %v119_v46  ;;  %v117_v47 = vand.u32 2147483647, %v113_v44  ;;  %v118_v48 = vand.u32 2147483647, %v114_v45 }
  0xde   :  { %v122_v49 = vmax.f32.f32 %v117_v47, %v118_v48 }
  0xe0   :  { %123 = vmax.xlane.f32.xlu1 %v122_v49 }
 0x169   :  { %v121_v50 = vpop.xlane.xlu1 %120 }
 0x16a   :  { %v125_v51 = vadd.f32 1e-08, %v121_v50  ;;  %v214_v50 = vld [vmem:[#allocation7] sm:$0xff] }
 0x16c   :  { %276 = vrcp.f32 %v125_v51  ;;  %v216_v51 = vstv %s269_s2 }
 0x16d   :  { %v124_v52 = vpop.xlane.xlu1 %123 }
 0x16e   :  { %v126_v54 = vadd.f32 1e-08, %v124_v52 }
 0x170   :  { %278 = vrcp.f32 %v126_v54  ;;  %v217_v54 = vmul.f32 %v216_v51, %v214_v50 }
 0x176   :  { %v277_v58 = vpop.eup %276 }
 0x177   :  { %v129_v60 = vmul.f32 %v277_v58, %v111_v38  ;;  %v130_v61 = vmul.f32 %v277_v58, %v112_v39  ;;  %v215_v58 = vld [vmem:[#allocation7 + $0x8] sm:$0xff] }
 0x178   :  { %v218_v62 = vmul.f32 %v216_v51, %v215_v58 }
 0x179   :  { %v133_v63 = vadd.f32 1.0, %v129_v60  ;;  %v134_v2 = vadd.f32 1.0, %v130_v61 }
 0x17a   :  { %v279_v5 = vpop.eup %278 }
 0x17b   :  { %v137_v8 = vmul.f32 0.5, %v133_v63  ;;  %v138_v9 = vmul.f32 0.5, %v134_v2  ;;  %v131_v10 = vmul.f32 %v279_v5, %v113_v44  ;;  %v132_v11 = vmul.f32 %v279_v5, %v114_v45 }
 0x17c   :  { %v219_v63 = vadd.f32 %v217_v54, %v446_v0 }
 0x17d   :  { %v135_v12 = vadd.f32 1.0, %v131_v10  ;;  %v136_v13 = vadd.f32 1.0, %v132_v11  ;;  %v153_v14 = vmul.f32 %v146_v3, %v137_v8  ;;  %v154_v15 = vmul.f32 %v150_v4, %v138_v9 }
 0x17e   :  { %v220_v9 = vadd.f32 %v218_v62, %v448_v1 }
 0x17f   :  { %v139_v17 = vmul.f32 0.5, %v135_v12  ;;  %v140_v18 = vmul.f32 0.5, %v136_v13  ;;  %v169_v19 = vadd.f32 %v162_v6, %v153_v14  ;;  %v170_v20 = vadd.f32 %v166_v7, %v154_v15 }
 0x181   :  { %v175_v22 = vmul.f32 %v174_v16, %v169_v19  ;;  %v176_v23 = vmul.f32 %v174_v16, %v170_v20  ;;  %v155_v24 = vmul.f32 %v146_v3, %v139_v17  ;;  %v156_v25 = vmul.f32 %v150_v4, %v140_v18 }
 0x183   :  { %v180_v26 = vadd.f32 %v179_v21, %v175_v22  ;;  %v181_v27 = vadd.f32 %v179_v21, %v176_v23  ;;  %v171_v28 = vadd.f32 %v162_v6, %v155_v24  ;;  %v172_v29 = vadd.f32 %v166_v7, %v156_v25 }
 0x185   :  { %v184_v30 = vmul.f32 %v180_v26, %v180_v26  ;;  %v185_v31 = vmul.f32 %v181_v27, %v181_v27  ;;  %v177_v32 = vmul.f32 %v174_v16, %v171_v28  ;;  %v178_v33 = vmul.f32 %v174_v16, %v172_v29 }
 0x187   :  { %v189_v34 = vsel %vm188_vm1, %v184_v30, 0.0  ;;  %v190_v35 = vsel %vm188_vm1, %v185_v31, 0.0  ;;  %v182_v36 = vadd.f32 %v179_v21, %v177_v32  ;;  %v183_v37 = vadd.f32 %v179_v21, %v178_v33 }
 0x188   :  { %v191_v38 = vadd.f32 %v190_v35, %v189_v34 }
 0x189   :  { %v186_v39 = vmul.f32 %v182_v36, %v182_v36  ;;  %v187_v40 = vmul.f32 %v183_v37, %v183_v37 }
 0x18a   :  { %192 = vadd.xlane.f32.xlu0 %v191_v38 }
 0x18b   :  { %v194_v41 = vsel %vm188_vm1, %v186_v39, 0.0  ;;  %v195_v42 = vsel %vm188_vm1, %v187_v40, 0.0 }
 0x18c   :  { %v196_v43 = vadd.f32 %v195_v42, %v194_v41 }
 0x18e   :  { %197 = vadd.xlane.f32.xlu1 %v196_v43 }
 0x217   :  { %v193_v44 = vpop.xlane.xlu0 %192 }
 0x218   :  { %v199_v45 = vmul.f32 0.00390625, %v193_v44 }
 0x21a   :  { %v201_v46 = vadd.f32 1e-08, %v199_v45 }
 0x21b   :  { %v198_v47 = vpop.xlane.xlu1 %197 }
 0x21c   :  { %280 = vrsqrt.f32 %v201_v46  ;;  %v200_v48 = vmul.f32 0.00390625, %v198_v47 }
 0x21e   :  { %v202_v49 = vadd.f32 1e-08, %v200_v48 }
 0x220   :  { %282 = vrsqrt.f32 %v202_v49 }
 0x226   :  { %v281_v52 = vpop.eup %280 }
 0x227   :  { %v205_v55 = vmul.f32 %v281_v52, %v180_v26  ;;  %v206_v57 = vmul.f32 %v281_v52, %v181_v27 }
 0x229   :  { %v210_v59 = vmul.f32 %v209_v53, %v205_v55  ;;  %v211_v60 = vmul.f32 %v209_v53, %v206_v57 }
 0x22a   :  { %v283_v61 = vpop.eup %282 }
 0x22b   :  { %v207_v2 = vmul.f32 %v283_v61, %v182_v36  ;;  %v208_v3 = vmul.f32 %v283_v61, %v183_v37  ;;  %v224_v4 = vrot.slane %v210_v59, %v452_v56  ;;  %v228_v5 = vrot.slane %v211_v60, %v452_v56 }
 0x22d   :  { %v212_v6 = vmul.f32 %v209_v53, %v207_v2  ;;  %v213_v7 = vmul.f32 %v209_v53, %v208_v3  ;;  %v241_v8 = vcombine.low %v224_v4, %v228_v5 }
 0x22f   :  { %v232_v10 = vrot.slane %v212_v6, %v452_v56  ;;  %v236_v11 = vrot.slane %v213_v7, %v452_v56  ;;  %v245_v12 = vmul.f32 %v241_v8, %v219_v63 }
 0x231   :  { %v242_v13 = vcombine.low %v232_v10, %v236_v11  ;;  %247 = vst [vmem:[#allocation9] sm:$0xff] %v245_v12 }
 0x233   :  { %v246_v0 = vmul.f32 %v242_v13, %v220_v9 }
 0x235   :  { %248 = vst [vmem:[#allocation9 + $0x8] sm:$0xff] %v246_v0 }
 0x236   :  { %349 = shalt.err (!%p346_p9)
}
 0x237   :  { %s350_s12 = scalar_lea.hbm %s488_s5, 256 }
 0x238   :  { %p351_p10 = scmp.ne.s32.totalorder %s488_s5, %s350_s12  ;;  %p354_p11 = scmp.lt.u32.totalorder %s350_s12, %s488_s5 }
 0x23a   :  { %p356_p12 = pnand %p354_p11, %p351_p10 }
 0x23c   :  { %359 = shalt.err (!%p356_p12)
}
 0x23d   :  { %260 = dma.vmem_to_hbm [thread:$0]  %s255_s8, 256, %s488_s5, [#allocation4], %s370_s0, %s370_s0, %s371_s13  }
 0x23e   :  { %366 = dma.done.wait [#allocation4], 256  }
 0x23f   :  { %367 = vsyncadd [#allocation4], 4294967040 }
 0x240   :  { %264 = vsyncpa [#allocation3], 1 }
 0x241   :  { %265 = vsyncpa [#allocation8], 1 }
 0x242   :  { %266 = vsyncpa [#allocation4], 1 }
 0x243   :  { %267 = vsyncpa [#allocation5], 1 }

</bundles_post_ra>
